<compile_context>
chip_gen: v7x
topology: tpu7x:2x2x1
jax: 0.10.0
libtpu: 0.0.40
codegen_flags: <defaults>
</compile_context>

<pallas_src>
import functools

import jax
import jax.numpy as jnp
import numpy as np
from jax.experimental import pallas as pl
from jax.experimental.pallas import tpu as pltpu


def _round_up(x, m):
    return (x + m - 1) // m * m


# ---------------------------------------------------------------------------
# Pallas kernel: in-VMEM im2col -> single fused-K MXU matmul -> folded BN
#                (+ residual) (+ ReLU) -> lane-dense store
# ---------------------------------------------------------------------------
def _conv_bn_kernel(x_ref, w_ref, scale_ref, bias_ref, *rest,
                    ksize, stride, Ho, Wo, apply_relu, has_residual):
    if has_residual:
        res_ref, out_ref, cols_ref = rest
    else:
        out_ref, cols_ref = rest
        res_ref = None

    s, K = stride, ksize

    # Build the (Ho*Wo, K*K*Cin) im2col slab for this image entirely in VMEM,
    # one output row at a time. The input was DMA'd exactly once (no K*K HBM
    # replication); the K*K expansion only ever exists in this scratch.
    def build_row(ho, carry):
        taps = []
        for kh in range(K):
            ph, oh = kh % s, kh // s
            for kw in range(K):
                pw, ow = kw % s, kw // s
                plane = ph * s + pw
                tap = x_ref[plane, pl.ds(ho + oh, 1), pl.ds(ow, Wo), :]  # (1, Wo, Cin) bf16
                taps.append(tap[0].astype(jnp.float32))                  # (Wo, Cin)
        row = taps[0] if len(taps) == 1 else jnp.concatenate(taps, axis=-1)
        row_start = pl.multiple_of(ho * Wo, Wo)
        cols_ref[pl.ds(row_start, Wo), :] = row
        return carry

    jax.lax.fori_loop(0, Ho, build_row, 0)

    # One fused-K matmul on the MXU (bf16 inputs, f32 accumulation).
    cols = cols_ref[...].astype(jnp.bfloat16)                 # (M, K*K*Cin)
    acc = jnp.dot(cols, w_ref[...], preferred_element_type=jnp.float32)

    y = acc * scale_ref[...] + bias_ref[...]                  # folded BatchNorm (f32)
    if has_residual:
        y = y + res_ref[...]
    if apply_relu:
        y = jnp.maximum(y, 0.0)
    out_ref[...] = y.astype(out_ref.dtype)                    # lane-dense (M, Coutp)


# ---------------------------------------------------------------------------
# JAX glue
# ---------------------------------------------------------------------------
def _space_to_blocks(x_nhwc, ksize, stride, padding):
    """Rearrange the single (unreplicated) input so that every conv tap is a
    contiguous, unstrided window: output (N, s*s, Hq, Wq, C); tap (kh, kw)
    lives in parity plane (kh%s)*s + (kw%s) at offset (kh//s, kw//s)."""
    N, H, W, C = x_nhwc.shape
    s = stride
    Ho = (H + 2 * padding - ksize) // s + 1
    Wo = (W + 2 * padding - ksize) // s + 1
    Hq = Ho + (ksize - 1) // s
    Wq = Wo + (ksize - 1) // s
    xp = jnp.pad(x_nhwc, ((0, 0),
                          (padding, s * Hq - H - padding),
                          (padding, s * Wq - W - padding),
                          (0, 0)))
    xb = xp.reshape(N, Hq, s, Wq, s, C)
    xb = jnp.transpose(xb, (0, 2, 4, 1, 3, 5)).reshape(N, s * s, Hq, Wq, C)
    return xb, (Ho, Wo)


def conv_bn(x_nhwc, w_oihw, bn_scale, bn_bias, *, stride, ksize, padding,
            residual=None, relu=False):
    """conv (no bias) + folded BN (+ residual) (+ ReLU). NHWC in / NHWC out."""
    N, H, W, Cin = x_nhwc.shape
    Cout = w_oihw.shape[0]
    Coutp = _round_up(Cout, 128)          # lane-dense output / weight / BN vectors

    xb, (Ho, Wo) = _space_to_blocks(x_nhwc, ksize, stride, padding)
    if ksize == 1:
        xb = xb[:, :1]                    # 1x1 conv only ever reads parity plane 0
    xb = xb.astype(jnp.bfloat16)          # bf16 activations in HBM/VMEM
    _, SS, Hq, Wq, _ = xb.shape
    M = Ho * Wo
    KKC = ksize * ksize * Cin

    # (Cout, Cin, Kh, Kw) -> (Kh*Kw*Cin, Coutp): row order matches the in-kernel
    # tap order (kh outer, kw inner, then Cin).
    w = jnp.transpose(w_oihw, (2, 3, 1, 0)).reshape(KKC, Cout)
    w = jnp.pad(w, ((0, 0), (0, Coutp - Cout))).astype(jnp.bfloat16)

    scale = jnp.pad(bn_scale.astype(jnp.float32), (0, Coutp - Cout)).reshape(1, Coutp)
    bias = jnp.pad(bn_bias.astype(jnp.float32), (0, Coutp - Cout)).reshape(1, Coutp)

    has_residual = residual is not None
    in_specs = [
        # One unreplicated image per grid step.
        pl.BlockSpec((None, SS, Hq, Wq, Cin), lambda n: (n, 0, 0, 0, 0)),
        # Weights / BN vectors: constant block index -> DMA'd once, reused.
        pl.BlockSpec((KKC, Coutp), lambda n: (0, 0)),
        pl.BlockSpec((1, Coutp), lambda n: (0, 0)),
        pl.BlockSpec((1, Coutp), lambda n: (0, 0)),
    ]
    args = [xb, w, scale, bias]
    if has_residual:
        res = residual.reshape(N, M, Cout).astype(jnp.float32)
        res = jnp.pad(res, ((0, 0), (0, 0), (0, Coutp - Cout)))
        in_specs.append(pl.BlockSpec((None, M, Coutp), lambda n: (n, 0, 0)))
        args.append(res)

    kernel = functools.partial(
        _conv_bn_kernel, ksize=ksize, stride=stride, Ho=Ho, Wo=Wo,
        apply_relu=relu, has_residual=has_residual)

    out = pl.pallas_call(
        kernel,
        out_shape=jax.ShapeDtypeStruct((N, M, Coutp), jnp.float32),
        grid_spec=pltpu.PrefetchScalarGridSpec(
            num_scalar_prefetch=0,
            grid=(N,),                                    # per-image tiles of M = Ho*Wo rows
            in_specs=in_specs,
            out_specs=pl.BlockSpec((None, M, Coutp), lambda n: (n, 0, 0)),
            scratch_shapes=[pltpu.VMEM((M, KKC), jnp.float32)],   # im2col slab
        ),
        compiler_params=pltpu.CompilerParams(
            dimension_semantics=("parallel",),            # v7x: split batch over both TCs
            vmem_limit_bytes=48 * 1024 * 1024,            # explicit, fits v7x's 64 MiB
        ),
    )(*args)

    return out[:, :, :Cout].reshape(N, Ho, Wo, Cout)


# ---------------------------------------------------------------------------
# BasicBlock forward
# ---------------------------------------------------------------------------
def _fold_bn(gamma, beta, mean, var, eps=1e-5):
    scale = gamma / jnp.sqrt(var + eps)
    return scale, beta - mean * scale


def basic_block_forward(x_nchw, params, *, in_planes, planes, stride,
                        dropout_rate=0.0):
    x = jnp.transpose(x_nchw, (0, 2, 3, 1))        # NCHW -> NHWC (C on lanes)

    s1, b1 = _fold_bn(*params["bn1"])
    h = conv_bn(x, params["conv1_w"], s1, b1,
                stride=stride, ksize=3, padding=1, relu=True)

    # nn.Dropout with rate 0 / eval mode is the identity.
    # TODO(synk): training-mode dropout (pltpu.prng_random_bits mask) not needed here.

    if stride != 1 or in_planes != planes:
        ss, sb = _fold_bn(*params["bn_sc"])
        shortcut = conv_bn(x, params["conv_sc_w"], ss, sb,
                           stride=stride, ksize=1, padding=0, relu=False)
    else:
        shortcut = x

    s2, b2 = _fold_bn(*params["bn2"])
    # TODO(synk): tile-level conv1->conv2 fusion (keep h in VMEM with a halo) would
    # remove one HBM round trip of h; kept as two pallas_calls for clarity.
    out = conv_bn(h, params["conv2_w"], s2, b2,
                  stride=1, ksize=3, padding=1,
                  residual=shortcut, relu=True)

    return jnp.transpose(out, (0, 3, 1, 2))        # NHWC -> NCHW


# ---------------------------------------------------------------------------
# Pure-JAX reference (bf16 conv inputs, f32 accumulation, like the kernel)
# ---------------------------------------------------------------------------
def _ref_conv(x, w, stride, padding):
    return jax.lax.conv_general_dilated(
        x.astype(jnp.bfloat16), w.astype(jnp.bfloat16),
        (stride, stride), [(padding, padding)] * 2,
        dimension_numbers=("NCHW", "OIHW", "NCHW"),
        preferred_element_type=jnp.float32)


def _ref_bn(x, gamma, beta, mean, var, eps=1e-5):
    r = lambda v: v.reshape(1, -1, 1, 1)
    return (x - r(mean)) / jnp.sqrt(r(var) + eps) * r(gamma) + r(beta)


def ref_basic_block(x, params, *, in_planes, planes, stride):
    h = jax.nn.relu(_ref_bn(_ref_conv(x, params["conv1_w"], stride, 1),
                            *params["bn1"]))
    h2 = _ref_bn(_ref_conv(h, params["conv2_w"], 1, 1), *params["bn2"])
    if stride != 1 or in_planes != planes:
        sc = _ref_bn(_ref_conv(x, params["conv_sc_w"], stride, 0),
                     *params["bn_sc"])
    else:
        sc = x
    return jax.nn.relu(h2 + sc)


# ---------------------------------------------------------------------------
if __name__ == "__main__":
    def make_params(key, in_planes, planes):
        ks = jax.random.split(key, 8)

        def bn_params(k):
            kg, kb, km, kv = jax.random.split(k, 4)
            gamma = 1.0 + 0.1 * jax.random.normal(kg, (planes,), jnp.float32)
            beta = 0.1 * jax.random.normal(kb, (planes,), jnp.float32)
            mean = 0.1 * jax.random.normal(km, (planes,), jnp.float32)
            var = 0.5 + jnp.abs(jax.random.normal(kv, (planes,), jnp.float32))
            return (gamma, beta, mean, var)

        return {
            "conv1_w": 0.2 * jax.random.normal(ks[0], (planes, in_planes, 3, 3),
                                               jnp.float32),
            "conv2_w": 0.2 * jax.random.normal(ks[1], (planes, planes, 3, 3),
                                               jnp.float32),
            "conv_sc_w": 0.2 * jax.random.normal(ks[2], (planes, in_planes, 1, 1),
                                                 jnp.float32),
            "bn1": bn_params(ks[3]),
            "bn2": bn_params(ks[4]),
            "bn_sc": bn_params(ks[5]),
        }

    key = jax.random.PRNGKey(0)
    k1, k2, k3, k4 = jax.random.split(key, 4)

    # Config 1: projection shortcut (stride=2, channel change).
    N, in_planes, planes, H, W, stride = 2, 4, 8, 16, 16, 2
    params = make_params(k1, in_planes, planes)
    x = jax.random.normal(k2, (N, in_planes, H, W), jnp.float32)

    out = jax.block_until_ready(
        basic_block_forward(x, params, in_planes=in_planes, planes=planes,
                            stride=stride))
    ref = ref_basic_block(x, params, in_planes=in_planes, planes=planes,
                          stride=stride)
    np.testing.assert_allclose(np.asarray(out), np.asarray(ref),
                               rtol=2e-4, atol=2e-4)
    assert out.shape == (N, planes, H // stride, W // stride)

    # Config 2: identity shortcut (stride=1, same channels).
    in_planes2 = planes2 = 8
    params2 = make_params(k3, in_planes2, planes2)
    x2 = jax.random.normal(k4, (N, in_planes2, H, W), jnp.float32)

    out2 = jax.block_until_ready(
        basic_block_forward(x2, params2, in_planes=in_planes2, planes=planes2,
                            stride=1))
    ref2 = ref_basic_block(x2, params2, in_planes=in_planes2, planes=planes2,
                           stride=1)
    np.testing.assert_allclose(np.asarray(out2), np.asarray(ref2),
                               rtol=2e-4, atol=2e-4)
    assert out2.shape == (N, planes2, H, W)

    print("KERNEL_OK")
</pallas_src>

<mosaic_0001>
module attributes {stable_mosaic.version = 11 : i64} {
  func.func @_conv_bn_kernel(%arg0: i32, %arg1: memref<1x4x9x9x4xbf16, #tpu.memory_space<vmem>>, %arg2: memref<36x128xbf16, #tpu.memory_space<vmem>>, %arg3: memref<1x128xf32, #tpu.memory_space<vmem>>, %arg4: memref<1x128xf32, #tpu.memory_space<vmem>>, %arg5: memref<1x64x128xf32, #tpu.memory_space<vmem>>, %arg6: memref<64x36xf32, #tpu.memory_space<vmem>>) attributes {dimension_semantics = [#tpu.dimension_semantics<parallel>], iteration_bounds = array<i64: 2>, scalar_prefetch = 0 : i64, scratch_operands = 1 : i64, tpu.core_type = #tpu.core_type<tc>, window_params = [{transform_indices = @transform_0, window_bounds = array<i64: 1, 4, 9, 9, 4>}, {pipeline_mode = #tpu.pipeline_mode<synchronous>, transform_indices = @transform_1, window_bounds = array<i64: 36, 128>}, {pipeline_mode = #tpu.pipeline_mode<synchronous>, transform_indices = @transform_2, window_bounds = array<i64: 1, 128>}, {pipeline_mode = #tpu.pipeline_mode<synchronous>, transform_indices = @transform_3, window_bounds = array<i64: 1, 128>}, {transform_indices = @transform_4, window_bounds = array<i64: 1, 64, 128>}]} {
    %c0_i32 = arith.constant 0 : i32
    %c8_i32 = arith.constant 8 : i32
    %0 = arith.addi %c0_i32, %c8_i32 : i32
    %c1_i32 = arith.constant 1 : i32
    scf.for %arg7 = %c0_i32 to %0 step %c1_i32  : i32 {
      %c0_i32_12 = arith.constant 0 : i32
      %16 = arith.addi %arg7, %c0_i32_12 : i32
      %c0_13 = arith.constant 0 : index
      %c0_14 = arith.constant 0 : index
      %17 = arith.index_cast %16 : i32 to index
      %c0_15 = arith.constant 0 : index
      %c0_16 = arith.constant 0 : index
      %18 = vector.load %arg1[%c0_13, %c0_14, %17, %c0_15, %c0_16] : memref<1x4x9x9x4xbf16, #tpu.memory_space<vmem>>, vector<1x1x1x8x4xbf16>
      %19 = vector.shape_cast %18 : vector<1x1x1x8x4xbf16> to vector<1x8x4xbf16>
      %20 = vector.shape_cast %19 : vector<1x8x4xbf16> to vector<8x4xbf16>
      %21 = arith.extf %20 : vector<8x4xbf16> to vector<8x4xf32>
      %c0_i32_17 = arith.constant 0 : i32
      %22 = arith.addi %arg7, %c0_i32_17 : i32
      %c0_18 = arith.constant 0 : index
      %c1 = arith.constant 1 : index
      %23 = arith.index_cast %22 : i32 to index
      %c0_19 = arith.constant 0 : index
      %c0_20 = arith.constant 0 : index
      %24 = vector.load %arg1[%c0_18, %c1, %23, %c0_19, %c0_20] : memref<1x4x9x9x4xbf16, #tpu.memory_space<vmem>>, vector<1x1x1x8x4xbf16>
      %25 = vector.shape_cast %24 : vector<1x1x1x8x4xbf16> to vector<1x8x4xbf16>
      %26 = vector.shape_cast %25 : vector<1x8x4xbf16> to vector<8x4xbf16>
      %27 = arith.extf %26 : vector<8x4xbf16> to vector<8x4xf32>
      %c0_i32_21 = arith.constant 0 : i32
      %28 = arith.addi %arg7, %c0_i32_21 : i32
      %c0_22 = arith.constant 0 : index
      %c0_23 = arith.constant 0 : index
      %29 = arith.index_cast %28 : i32 to index
      %c1_24 = arith.constant 1 : index
      %c0_25 = arith.constant 0 : index
      %30 = vector.load %arg1[%c0_22, %c0_23, %29, %c1_24, %c0_25] : memref<1x4x9x9x4xbf16, #tpu.memory_space<vmem>>, vector<1x1x1x8x4xbf16>
      %31 = vector.shape_cast %30 : vector<1x1x1x8x4xbf16> to vector<1x8x4xbf16>
      %32 = vector.shape_cast %31 : vector<1x8x4xbf16> to vector<8x4xbf16>
      %33 = arith.extf %32 : vector<8x4xbf16> to vector<8x4xf32>
      %c0_i32_26 = arith.constant 0 : i32
      %34 = arith.addi %arg7, %c0_i32_26 : i32
      %c0_27 = arith.constant 0 : index
      %c2 = arith.constant 2 : index
      %35 = arith.index_cast %34 : i32 to index
      %c0_28 = arith.constant 0 : index
      %c0_29 = arith.constant 0 : index
      %36 = vector.load %arg1[%c0_27, %c2, %35, %c0_28, %c0_29] : memref<1x4x9x9x4xbf16, #tpu.memory_space<vmem>>, vector<1x1x1x8x4xbf16>
      %37 = vector.shape_cast %36 : vector<1x1x1x8x4xbf16> to vector<1x8x4xbf16>
      %38 = vector.shape_cast %37 : vector<1x8x4xbf16> to vector<8x4xbf16>
      %39 = arith.extf %38 : vector<8x4xbf16> to vector<8x4xf32>
      %c0_i32_30 = arith.constant 0 : i32
      %40 = arith.addi %arg7, %c0_i32_30 : i32
      %c0_31 = arith.constant 0 : index
      %c3 = arith.constant 3 : index
      %41 = arith.index_cast %40 : i32 to index
      %c0_32 = arith.constant 0 : index
      %c0_33 = arith.constant 0 : index
      %42 = vector.load %arg1[%c0_31, %c3, %41, %c0_32, %c0_33] : memref<1x4x9x9x4xbf16, #tpu.memory_space<vmem>>, vector<1x1x1x8x4xbf16>
      %43 = vector.shape_cast %42 : vector<1x1x1x8x4xbf16> to vector<1x8x4xbf16>
      %44 = vector.shape_cast %43 : vector<1x8x4xbf16> to vector<8x4xbf16>
      %45 = arith.extf %44 : vector<8x4xbf16> to vector<8x4xf32>
      %c0_i32_34 = arith.constant 0 : i32
      %46 = arith.addi %arg7, %c0_i32_34 : i32
      %c0_35 = arith.constant 0 : index
      %c2_36 = arith.constant 2 : index
      %47 = arith.index_cast %46 : i32 to index
      %c1_37 = arith.constant 1 : index
      %c0_38 = arith.constant 0 : index
      %48 = vector.load %arg1[%c0_35, %c2_36, %47, %c1_37, %c0_38] : memref<1x4x9x9x4xbf16, #tpu.memory_space<vmem>>, vector<1x1x1x8x4xbf16>
      %49 = vector.shape_cast %48 : vector<1x1x1x8x4xbf16> to vector<1x8x4xbf16>
      %50 = vector.shape_cast %49 : vector<1x8x4xbf16> to vector<8x4xbf16>
      %51 = arith.extf %50 : vector<8x4xbf16> to vector<8x4xf32>
      %c1_i32_39 = arith.constant 1 : i32
      %52 = arith.addi %arg7, %c1_i32_39 : i32
      %c0_40 = arith.constant 0 : index
      %c0_41 = arith.constant 0 : index
      %53 = arith.index_cast %52 : i32 to index
      %c0_42 = arith.constant 0 : index
      %c0_43 = arith.constant 0 : index
      %54 = vector.load %arg1[%c0_40, %c0_41, %53, %c0_42, %c0_43] : memref<1x4x9x9x4xbf16, #tpu.memory_space<vmem>>, vector<1x1x1x8x4xbf16>
      %55 = vector.shape_cast %54 : vector<1x1x1x8x4xbf16> to vector<1x8x4xbf16>
      %56 = vector.shape_cast %55 : vector<1x8x4xbf16> to vector<8x4xbf16>
      %57 = arith.extf %56 : vector<8x4xbf16> to vector<8x4xf32>
      %c1_i32_44 = arith.constant 1 : i32
      %58 = arith.addi %arg7, %c1_i32_44 : i32
      %c0_45 = arith.constant 0 : index
      %c1_46 = arith.constant 1 : index
      %59 = arith.index_cast %58 : i32 to index
      %c0_47 = arith.constant 0 : index
      %c0_48 = arith.constant 0 : index
      %60 = vector.load %arg1[%c0_45, %c1_46, %59, %c0_47, %c0_48] : memref<1x4x9x9x4xbf16, #tpu.memory_space<vmem>>, vector<1x1x1x8x4xbf16>
      %61 = vector.shape_cast %60 : vector<1x1x1x8x4xbf16> to vector<1x8x4xbf16>
      %62 = vector.shape_cast %61 : vector<1x8x4xbf16> to vector<8x4xbf16>
      %63 = arith.extf %62 : vector<8x4xbf16> to vector<8x4xf32>
      %c1_i32_49 = arith.constant 1 : i32
      %64 = arith.addi %arg7, %c1_i32_49 : i32
      %c0_50 = arith.constant 0 : index
      %c0_51 = arith.constant 0 : index
      %65 = arith.index_cast %64 : i32 to index
      %c1_52 = arith.constant 1 : index
      %c0_53 = arith.constant 0 : index
      %66 = vector.load %arg1[%c0_50, %c0_51, %65, %c1_52, %c0_53] : memref<1x4x9x9x4xbf16, #tpu.memory_space<vmem>>, vector<1x1x1x8x4xbf16>
      %67 = vector.shape_cast %66 : vector<1x1x1x8x4xbf16> to vector<1x8x4xbf16>
      %68 = vector.shape_cast %67 : vector<1x8x4xbf16> to vector<8x4xbf16>
      %69 = arith.extf %68 : vector<8x4xbf16> to vector<8x4xf32>
      %70 = tpu.concatenate %21, %27, %33, %39, %45, %51, %57, %63, %69 in 1 : vector<8x4xf32>, vector<8x4xf32>, vector<8x4xf32>, vector<8x4xf32>, vector<8x4xf32>, vector<8x4xf32>, vector<8x4xf32>, vector<8x4xf32>, vector<8x4xf32> -> vector<8x36xf32>
      %c8_i32_54 = arith.constant 8 : i32
      %71 = arith.muli %arg7, %c8_i32_54 : i32
      %72 = tpu.assume_multiple %71, 8 : i32
      %73 = arith.index_cast %72 : i32 to index
      %c0_55 = arith.constant 0 : index
      %74 = vector.load %arg6[%73, %c0_55] : memref<64x36xf32, #tpu.memory_space<vmem>>, vector<8x36xf32>
      tpu.vector_store %arg6[%73, %c0_55], %70 {strides = array<i32>} : memref<64x36xf32, #tpu.memory_space<vmem>>, vector<8x36xf32>,
    }
    %c8_i32_0 = arith.constant 8 : i32
    %c0 = arith.constant 0 : index
    %c0_1 = arith.constant 0 : index
    %1 = vector.load %arg6[%c0, %c0_1] : memref<64x36xf32, #tpu.memory_space<vmem>>, vector<64x36xf32>
    %2 = arith.truncf %1 : vector<64x36xf32> to vector<64x36xbf16>
    %c0_2 = arith.constant 0 : index
    %c0_3 = arith.constant 0 : index
    %3 = vector.load %arg2[%c0_2, %c0_3] : memref<36x128xbf16, #tpu.memory_space<vmem>>, vector<36x128xbf16>
    %cst = arith.constant dense<0.000000e+00> : vector<64x128xf32>
    %4 = tpu.matmul %2, %3, %cst {dimension_numbers = #tpu.dot_dimension_numbers<[1], [0], [0], [1], [0, 0, 1, 1], [], []>} : vector<64x36xbf16>, vector<36x128xbf16>, vector<64x128xf32> -> vector<64x128xf32>
    %c0_4 = arith.constant 0 : index
    %c0_5 = arith.constant 0 : index
    %5 = vector.load %arg3[%c0_4, %c0_5] : memref<1x128xf32, #tpu.memory_space<vmem>>, vector<1x128xf32>
    %6 = vector.broadcast %5 : vector<1x128xf32> to vector<64x128xf32>
    %7 = arith.mulf %4, %6 : vector<64x128xf32>
    %c0_6 = arith.constant 0 : index
    %c0_7 = arith.constant 0 : index
    %8 = vector.load %arg4[%c0_6, %c0_7] : memref<1x128xf32, #tpu.memory_space<vmem>>, vector<1x128xf32>
    %9 = vector.broadcast %8 : vector<1x128xf32> to vector<64x128xf32>
    %10 = arith.addf %7, %9 : vector<64x128xf32>
    %cst_8 = arith.constant 0.000000e+00 : f32
    %11 = vector.broadcast %cst_8 : f32 to vector<64x128xf32>
    %12 = arith.maximumf %10, %11 : vector<64x128xf32>
    %c0_9 = arith.constant 0 : index
    %c0_10 = arith.constant 0 : index
    %c0_11 = arith.constant 0 : index
    %13 = vector.load %arg5[%c0_9, %c0_10, %c0_11] : memref<1x64x128xf32, #tpu.memory_space<vmem>>, vector<1x64x128xf32>
    %14 = vector.shape_cast %13 : vector<1x64x128xf32> to vector<64x128xf32>
    %15 = vector.shape_cast %12 : vector<64x128xf32> to vector<1x64x128xf32>
    tpu.vector_store %arg5[%c0_9, %c0_10, %c0_11], %15 {strides = array<i32>} : memref<1x64x128xf32, #tpu.memory_space<vmem>>, vector<1x64x128xf32>,
    return
  }
  func.func @transform_0(%arg0: i32) -> (i32, i32, i32, i32, i32) {
    %c0_i32 = arith.constant 0 : i32
    %c0_i32_0 = arith.constant 0 : i32
    %c0_i32_1 = arith.constant 0 : i32
    %c0_i32_2 = arith.constant 0 : i32
    %c0_i32_3 = arith.constant 0 : i32
    return %arg0, %c0_i32, %c0_i32_0, %c0_i32_1, %c0_i32_2 : i32, i32, i32, i32, i32
  }
  func.func @transform_1(%arg0: i32) -> (i32, i32) {
    %c0_i32 = arith.constant 0 : i32
    %c0_i32_0 = arith.constant 0 : i32
    %c0_i32_1 = arith.constant 0 : i32
    return %c0_i32, %c0_i32_0 : i32, i32
  }
  func.func @transform_2(%arg0: i32) -> (i32, i32) {
    %c0_i32 = arith.constant 0 : i32
    %c0_i32_0 = arith.constant 0 : i32
    %c0_i32_1 = arith.constant 0 : i32
    return %c0_i32, %c0_i32_0 : i32, i32
  }
  func.func @transform_3(%arg0: i32) -> (i32, i32) {
    %c0_i32 = arith.constant 0 : i32
    %c0_i32_0 = arith.constant 0 : i32
    %c0_i32_1 = arith.constant 0 : i32
    return %c0_i32, %c0_i32_0 : i32, i32
  }
  func.func @transform_4(%arg0: i32) -> (i32, i32, i32) {
    %c0_i32 = arith.constant 0 : i32
    %c0_i32_0 = arith.constant 0 : i32
    %c0_i32_1 = arith.constant 0 : i32
    return %arg0, %c0_i32, %c0_i32_0 : i32, i32, i32
  }
}

</mosaic_0001>

<bundles_post_ra>
// kernel: tpu_custom_call.1
= control target key start
LH: loop header
LB: loop body
LE: loop exit
PB: predicated region body
PF: predicated region fallthrough
CT: control target
= control target key end

     0   :  { %9 = vsyncpa [#allocation4], 0  ;;  %s967_s0 = inlined_call_operand.vmem [shape: bf16[2,4,9,9,4], index: 0, kind: input, shape index: {}]   ;;  %s968_s1 = inlined_call_operand.vmem [shape: bf16[36,128], index: 1, kind: input, shape index: {}]   ;;  %s969_s2 = inlined_call_operand.vmem [shape: f32[1,128], index: 2, kind: input, shape index: {}]   ;;  %s970_s3 = inlined_call_operand.vmem [shape: f32[1,128], index: 3, kind: input, shape index: {}]   ;;  %s971_s4 = inlined_call_operand.hbm [shape: f32[2,64,128], index: 4, kind: output, shape index: {}]  }
   0x1   :  { %11 = vsyncpa [#allocation4 + $0x1], 0  ;;  %s810_s15 = smov 0   ;;  %s812_s16 = smov 0  }
   0x2   :  { %s814_s17 = smov 0   ;;  %s816_s18 = smov 0  }
   0x3 LB: > { %s831_s19 = sadd.s32 4294967295, %s768_s18   ;;  %s567_s20 = sadd.s32 4294967294, %s768_s18   ;;  %s768_s18 = sphi %s816_s18, %s977_s18   ;;  %s764_s17 = sphi %s814_s17, %s976_s17   ;;  %s760_s16 = sphi %s812_s16, %s975_s16   ;;  %s756_s15 = sphi %s810_s15, %s974_s15  }
   0x4   : > { %s835_s21 = sadd.s32 1, %s768_s18   ;;  %s113_s22 = sadd.s32 1, %s764_s17 }
   0x5   : > { %s110_s23 = ssub.s32 %s768_s18, %s835_s21  ;;  %p123_p0 = scmp.ne.s32.totalorder %s764_s17, %s760_s16 }
   0x6   : > { %p111_p1 = scmp.eq.s32.totalorder %s110_s23, 0  ;;  %p124_p2 = scmp.eq.s32.totalorder %s831_s19, 1 }
   0x7   : > { %p129_p3 = scmp.ne.s32.totalorder %s760_s16, %s756_s15  ;;  %p130_p4 = scmp.eq.s32.totalorder %s567_s20, 1 }
   0x8   : > { %s846_s24 = scalar_select %p111_p1, %s764_s17, %s113_s22  }
   0x9   : > { %p848_p5 = por %p124_p2, %p123_p0  ;;  %p852_p6 = por %p130_p4, %p129_p3 }
   0xa   : > { %p570_p7 = scmp.ge.s32.totalorder %s768_s18, 1  ;;  %p165_p8 = scmp.lt.s32.totalorder %s768_s18, 3 }
   0xc   : > { %p166_p9 = pnand %p570_p7, %p165_p8 }
   0xd   : > { %s188_s27 = sand.u32 (!%p166_p9), 1, %s760_s16   ;;  %p191_p10 = scmp.lt.s32.totalorder (!%p166_p9), %s831_s19, 1 }
   0xe   : > { %169 = sbr.rel (%p166_p9) target bundleno = 408 (0x198), region = 36  ;;  %s571_s28 = sshll.u32 (!%p166_p9), %s188_s27, 6 }
   0xf   : > { %s868_s8 = scalar_lea.vmem (!%p166_p9), [#allocation3], %s571_s28  ;;  %s870_s9 = smov (!%p166_p9), 0  }
  0x15   : > { %s192_s29 = scalar_select %p191_p10, %s831_s19, 1 }
  0x17   : > { %s641_s30 = smul.u32 288, %s192_s29 }
  0x19   : > { %s866_s7 = scalar_lea.vmem %s967_s0, %s641_s30 }
  0x1a LB: >> { %s606_s10 = sshll.u32 %s772_s9, 3  ;;  %vm246_vm0 = vcmask 1046528   ;;  %s774_s12 = smov 4   ;;  %vm283_vm1 = vcmask 31744   ;;  %vm285_vm2 = vcmask 64512   ;;  %vm287_vm3 = vcmask 97280   ;;  %s772_s9 = sphi %s870_s9, %s202_s9  }
  0x1b   : >> { %s205_s11 = scalar_lea.vmem %s866_s7, %s606_s10  ;;  %s775_s13 = smov 12   ;;  %vm289_vm4 = vcmask 130048   ;;  %vm291_vm5 = vcmask 162816   ;;  %vm293_vm6 = vcmask 195584   ;;  %vm295_vm7 = vcmask 228352  }
  0x1c   : >> { %v577_v0 = vld [vmem:[%s205_s11 + $0x48] ss:$72 sps:$4 sm:$0xff]   ;;  %v206_v1 = vld [vmem:[%s205_s11] ss:$216 sps:$4 sm:$0xff]   ;;  %v213_v2 = vld [vmem:[%s205_s11 + $0x4] sm:$0x1] }
  0x1d   : >> { %v212_v3 = vunpack.c.l.bf16 %v577_v0  ;;  %v219_v4 = vunpack.c.h.bf16 %v577_v0  ;;  %v207_v5 = vunpack.c.l.bf16 %v206_v1  ;;  %v214_v6 = vunpack.c.l.bf16 %v213_v2  ;;  %v584_v7 = vld [vmem:[%s205_s11 + $0x94] sm:$0x1]  ;;  %v586_v8 = vld [vmem:[%s205_s11 + $0x8] ss:$72 sps:$4 sm:$0xff]   ;;  %v590_v10 = vld [vmem:[%s205_s11 + $0xc] sm:$0x1] }
  0x1e   : >> { %v226_v9 = vunpack.c.l.bf16 %v584_v7  ;;  %v224_v13 = vunpack.c.h.bf16 %v206_v1  ;;  %v232_v16 = vunpack.c.l.bf16 %v586_v8  ;;  %v239_v17 = vunpack.c.l.bf16 %v590_v10  ;;  %s776_s14 = smov 8   ;;  %s777_s20 = smov 16  }
  0x1f   : >> { %241 = vrot.lane.b32.xlu0 %v212_v3, %s774_s12  ;;  %254 = vrot.lane.b32.xlu1 %v219_v4, %s775_s13  ;;  %v247_v11 = vrot.slane %v207_v5, 1  ;;  %v248_v12 = vrot.slane %v214_v6, 1  ;;  %v262_v14 = vrot.slane %v219_v4, 1  ;;  %s778_s22 = smov 20   ;;  %s779_s23 = smov 24   ;;  %v237_v22 = vunpack.c.h.bf16 %v586_v8 }
  0x20   : >> { %v263_v15 = vrot.slane %v226_v9, 1  ;;  %v277_v20 = vrot.slane %v232_v16, 1  ;;  %v278_v21 = vrot.slane %v239_v17, 1  ;;  %s780_s28 = smov 28   ;;  %s781_s29 = smov 32   ;;  %vm297_vm8 = vcmask 261120  }
  0x21   : >> { %v249_v18 = vsel %vm246_vm0, %v247_v11, %v248_v12  ;;  %vm301_vm9 = vcmask 293888   ;;  %s300_s30 = scalar_lea.vmem [#allocation2], %s606_s10  ;;  %s202_s9 = sadd.s32 1, %s772_s9  }
  0x22   : >> { %v264_v19 = vsel %vm246_vm0, %v262_v14, %v263_v15  ;;  %v279_v23 = vsel %vm246_vm0, %v277_v20, %v278_v21  ;;  %p199_p11 = scmp.ge.s32.totalorder %s202_s9, 8  }
  0x23   : >> { %250 = vrot.lane.b32.xlu0 %v249_v18, %s776_s14  ;;  %258 = vrot.lane.b32.xlu1 %v224_v13, %s777_s20  ;;  %v699_v40 = vld [vmem:[%s968_s1] sm:$0xff] (%p199_p11)   ;;  %v700_v41 = vld [vmem:[%s968_s1 + $0x8] sm:$0xff] (%p199_p11)   ;;  %vm348_vm10 = vcmask (%p199_p11), 1041408   ;;  %s782_s6 = smov (%p199_p11), [#allocation3]  }
  0x24   : > { %619 = vmatprep.subr.bf16.mxu0 (%p199_p11), %v699_v40  ;;  %633 = vmatprep.subr.bf16.mxu1 (%p199_p11), %v699_v40  ;;  %v701_v46 = vld [vmem:[%s968_s1 + $0x10] ss:$0 sps:$4 sm:$0x33] (%p199_p11)   ;;  %v599_v56 = vld [vmem:[%s969_s2] ss:$0 sm:$0xff] (%p199_p11)  ;;  %s706_s11 = sshll.u32 (%p199_p11), %s782_s6, 4  ;;  %s707_s11 = int_to_ptr.vmem [resolvable:$false] %s706_s11 }
  0x25   : > { %620 = vmatpush3.bf16.msra.mxu0 (%p199_p11), %v699_v40  ;;  %636 = vmatpush3.bf16.msra.mxu1 (%p199_p11), %v699_v40  ;;  %v350_v53 = vsel (%p199_p11), %vm348_vm10, %v701_v46, 0  ;;  %v600_v58 = vld [vmem:[%s970_s3] ss:$0 sm:$0xff] (%p199_p11)  ;;  %s708_s12 = scalar_lea.vmem (%p199_p11), %s707_s11, 2048 }
  0x26   : > { %621 = vmatprep.subr.bf16.mxu0 (%p199_p11), %v700_v41  ;;  %634 = vmatprep.subr.bf16.mxu1 (%p199_p11), %v700_v41 }
  0x27   : >> { %265 = vrot.lane.b32.xlu0 %v264_v19, %s778_s22  ;;  %269 = vrot.lane.b32.xlu1 %v232_v16, %s779_s23  ;;  %s611_s22 = sshll.u32 (%p199_p11), %s831_s19, 10  ;;  %s477_s23 = sshll.u32 (%p199_p11), %s868_s8, 4  ;;  %s916_s23 = int_to_ptr.vmem [resolvable:$true] %s477_s23 }
  0x28   : > { %s702_s5 = scalar_lea.vmem (%p199_p11), %s916_s23, 1024  ;;  %p709_p1 = scmp.lt.s32.totalorder (%p199_p11), %s916_s23, %s707_s11 }
  0x29   : > { %622 = vmatpush3.bf16.msra.mxu0 (%p199_p11), %v700_v41  ;;  %637 = vmatpush3.bf16.msra.mxu1 (%p199_p11), %v700_v41  ;;  %p703_p12 = scmp.ne.s32.totalorder (%p199_p11), %s916_s23, %s702_s5  ;;  %p710_p2 = scmp.lt.s32.totalorder (%p199_p11), %s708_s12, %s702_s5 }
  0x2a   : > { %639 = vmatprep.subr.msk.bf16.mxu0 (%p199_p11), %vm348_vm10, %v701_v46  ;;  %640 = vmatprep.subr.msk.bf16.mxu1 (%p199_p11), %vm348_vm10, %v701_v46 }
  0x2b   : >> { %273 = vrot.lane.b32.xlu0 %v237_v22, %s780_s28  ;;  %280 = vrot.lane.b32.xlu1 %v279_v23, %s781_s29  ;;  %s914_s29 = scalar_lea.hbm (%p199_p11), %s971_s4, %s611_s22  ;;  %p704_p13 = pnand (%p199_p11), %p703_p12, %p848_p5 }
  0x2c   : > { %p711_p3 = por (%p199_p11), %p710_p2, %p709_p1 }
  0x2d   : > { %624 = vmatpush3.bf16.msra.mxu0 (%p199_p11), %v350_v53  ;;  %638 = vmatpush3.bf16.msra.mxu1 (%p199_p11), %v350_v53  ;;  %p705_p0 = pneg (%p199_p11), %p704_p13 }
  0x2f   : > { %p712_p4 = pnand (%p199_p11), %p711_p3, %p705_p0 }
  0x91   : >> { %v242_v24 = vpop.permute.xlu0 %241  ;;  %v255_v25 = vpop.permute.xlu1 %254 }
  0x92   : >> { %v284_v26 = vsel %vm283_vm1, %v207_v5, %v242_v24 }
  0x95   : >> { %v251_v27 = vpop.permute.xlu0 %250  ;;  %v259_v28 = vpop.permute.xlu1 %258 }
  0x96   : >> { %v286_v29 = vsel %vm285_vm2, %v284_v26, %v251_v27 }
  0x97   : >> { %v288_v30 = vsel %vm287_vm3, %v286_v29, %v255_v25 }
  0x98   : >> { %v290_v31 = vsel %vm289_vm4, %v288_v30, %v259_v28 }
  0x99   : >> { %v266_v32 = vpop.permute.xlu0 %265  ;;  %v270_v33 = vpop.permute.xlu1 %269 }
  0x9a   : >> { %v292_v34 = vsel %vm291_vm5, %v290_v31, %v266_v32  ;;  %201 = sbr.rel (!%p199_p11) target bundleno = 26 (0x1a), region = 85 }
  0x9b   : >> { %v294_v35 = vsel %vm293_vm6, %v292_v34, %v270_v33 }
  0x9d   : >> { %v274_v36 = vpop.permute.xlu0 %273  ;;  %v281_v37 = vpop.permute.xlu1 %280 }
  0x9e   : >> { %v296_v38 = vsel %vm295_vm7, %v294_v35, %v274_v36 }
  0x9f   : >> { %v298_v39 = vsel %vm297_vm8, %v296_v38, %v281_v37 }
  0xa0   : >> { %302 = vst.msk [vmem:[%s300_s30] sm:$0xff] %vm301_vm9, %v298_v39  ;;  %s926_s30 = scalar_lea.sflag (%p199_p11), [#allocation4], %s188_s27 }
  0xa7   : > { %v303_v42 = vld [vmem:[#allocation2] sm:$0xff]  ;;  %v304_v43 = vld [vmem:[#allocation2 + $0x8] sm:$0xff]  ;;  %v305_v49 = vld [vmem:[#allocation2 + $0x10] sm:$0xff] }
  0xa8   : > { %v307_v44 = vld [vmem:[#allocation2 + $0x20] sm:$0xff]  ;;  %v308_v45 = vld [vmem:[#allocation2 + $0x28] sm:$0xff]  ;;  %v311_v47 = vpack.c.bf16 %v304_v43, %v303_v42  ;;  %v306_v50 = vld [vmem:[#allocation2 + $0x18] sm:$0xff] }
  0xa9   : > { %v313_v48 = vpack.c.bf16 %v308_v45, %v307_v44  ;;  %v309_v51 = vld [vmem:[#allocation2 + $0x30] sm:$0xff]  ;;  %v310_v52 = vld [vmem:[#allocation2 + $0x38] sm:$0xff]  ;;  %v312_v54 = vpack.c.bf16 %v306_v50, %v305_v49 }
  0xaa   : > { %625 = vmatprep.mubr.msk.bf16.mxu0 %vm301_vm9, %v311_v47  ;;  %v314_v55 = vpack.c.bf16 %v310_v52, %v309_v51 }
  0xab   : > { %629 = vmatprep.mubr.msk.bf16.mxu1 %vm301_vm9, %v313_v48  ;;  %626 = vmatmul.mubr.msk.bf16.vlgmr.msra.gmra.mrb[0].mxu0 %vm301_vm9, %v312_v54 }
  0xac   : > { %630 = vmatmul.mubr.msk.bf16.vlgmr.msra.gmra.mrb[0].mxu1 %vm301_vm9, %v314_v55 }
 0x17e   : > { %v627_v57 = vpop.f32.mrb[0].mxu0 }
 0x17f   : > { %v631_v59 = vpop.f32.mrb[0].mxu1  ;;  %v426_v60 = vmul.f32 %v627_v57, %v599_v56  ;;  %v386_v62 = vpop.f32.mrb[1].mxu0 }
 0x180   : > { %v430_v61 = vmul.f32 %v631_v59, %v599_v56  ;;  %v402_v63 = vpop.f32.mrb[1].mxu1  ;;  %v424_v0 = vmul.f32 %v599_v56, %v386_v62  ;;  %v628_v2 = vpop.f32.mrb[2].mxu0 }
 0x181   : > { %v428_v1 = vmul.f32 %v599_v56, %v402_v63  ;;  %v632_v3 = vpop.f32.mrb[2].mxu1  ;;  %v441_v4 = vadd.f32 %v600_v58, %v426_v60  ;;  %v427_v6 = vmul.f32 %v628_v2, %v599_v56  ;;  %v389_v8 = vpop.f32.mrb[3].mxu0 }
 0x182   : > { %v445_v5 = vadd.f32 %v600_v58, %v430_v61  ;;  %v431_v7 = vmul.f32 %v632_v3, %v599_v56  ;;  %v405_v9 = vpop.f32.mrb[3].mxu1  ;;  %v439_v10 = vadd.f32 %v600_v58, %v424_v0  ;;  %v425_v12 = vmul.f32 %v599_v56, %v389_v8 }
 0x183   : > { %v443_v11 = vadd.f32 %v600_v58, %v428_v1  ;;  %v429_v13 = vmul.f32 %v599_v56, %v405_v9  ;;  %v449_v14 = vmax.f32 %v441_v4, 0.0  ;;  %v442_v16 = vadd.f32 %v600_v58, %v427_v6 }
 0x184   : > { %v453_v15 = vmax.f32 %v445_v5, 0.0  ;;  %v446_v17 = vadd.f32 %v600_v58, %v431_v7  ;;  %v447_v18 = vmax.f32 %v439_v10, 0.0  ;;  %v440_v20 = vadd.f32 %v600_v58, %v425_v12 }
 0x185   : > { %v451_v19 = vmax.f32 %v443_v11, 0.0  ;;  %v444_v21 = vadd.f32 %v600_v58, %v429_v13  ;;  %457 = vst [vmem:[%s868_s8 + $0x10] sm:$0xff] %v449_v14  ;;  %v450_v22 = vmax.f32 %v442_v16, 0.0 }
 0x186   : > { %461 = vst [vmem:[%s868_s8 + $0x30] sm:$0xff] %v453_v15  ;;  %v454_v23 = vmax.f32 %v446_v17, 0.0  ;;  %455 = vst [vmem:[%s868_s8] sm:$0xff] %v447_v18  ;;  %v448_v24 = vmax.f32 %v440_v20, 0.0 }
 0x187   : > { %459 = vst [vmem:[%s868_s8 + $0x20] sm:$0xff] %v451_v19  ;;  %v452_v25 = vmax.f32 %v444_v21, 0.0  ;;  %458 = vst [vmem:[%s868_s8 + $0x18] sm:$0xff] %v450_v22 }
 0x188   : > { %462 = vst [vmem:[%s868_s8 + $0x38] sm:$0xff] %v454_v23  ;;  %456 = vst [vmem:[%s868_s8 + $0x8] sm:$0xff] %v448_v24 }
 0x189   : > { %460 = vst [vmem:[%s868_s8 + $0x28] sm:$0xff] %v452_v25 }
 0x18a   : > { %715 = shalt.err (!%p712_p4)
}
 0x18b   : > { %s716_s27 = scalar_lea.hbm %s914_s29, 1024  ;;  %s720_s10 = scalar_lea.hbm %s971_s4, 2048 }
 0x18c   : > { %p717_p7 = scmp.ne.s32.totalorder %s914_s29, %s716_s27  ;;  %p721_p10 = scmp.lt.u32.totalorder %s914_s29, %s971_s4 }
 0x18d   : > { %p722_p11 = scmp.lt.u32.totalorder %s720_s10, %s716_s27  ;;  %p724_p13 = scmp.lt.u32.totalorder %s716_s27, %s914_s29 }
 0x18e   : > { %p718_p8 = pnand %p717_p7, %p848_p5 }
 0x18f   : > { %p723_p12 = por %p722_p11, %p721_p10 }
 0x190   : > { %p719_p9 = pneg %p718_p8 }
 0x191   : > { %p725_p0 = por %p724_p13, %p723_p12 }
 0x193   : > { %p726_p1 = pnand %p725_p0, %p719_p9 }
 0x195   : > { %729 = shalt.err (!%p726_p1)
}
 0x196   : > { %s783_s14 = smov 128   ;;  %s784_s20 = smov 8  }
 0x197   : > { %642 = dma.vmem_to_hbm [thread:$0]  (%p848_p5), %s916_s23, 1024, %s914_s29, %s926_s30, %s783_s14, %s783_s14, %s784_s20  }
 0x198 PF: > { %p648_p2 = scmp.ge.s32.totalorder %s768_s18, 2  ;;  %s492_s22 = sand.u32 1, %s756_s15  }
 0x199   : > { %s493_s19 = scalar_lea.sflag [#allocation4], %s492_s22 }
 0x19a   : > { %p645_p3 = pnand %p648_p2, %p852_p6 }
 0x19c   : > { %751 = dma.done.wait (!%p645_p3), %s493_s19, 1024  }
 0x19d   : > { %753 = vsyncadd (!%p645_p3), %s493_s19, 4294966272  ;;  %p14_p4 = scmp.ge.s32.totalorder %s835_s21, 4   ;;  %s974_s15 = smov %s760_s16 }
 0x19e   : > { %s975_s16 = smov %s764_s17  ;;  %s976_s17 = smov %s846_s24 }
 0x19f   : > { %s977_s18 = smov %s835_s21  ;;  %16 = sbr.rel (!%p14_p4) target bundleno = 3 (0x3), region = 96 }
 0x1a6   :  { %498 = vsyncpa [#allocation4], 1 }
 0x1a7   :  { %500 = vsyncpa [#allocation4 + $0x1], 1 }

</bundles_post_ra>
